<compile_context>
chip_gen: v7x
topology: tpu7x:2x2x1
jax: 0.10.0
libtpu: 0.0.40
codegen_flags: <defaults>
</compile_context>

<pallas_src>
import jax
import jax.numpy as jnp
from jax.experimental import pallas as pl
from jax.experimental.pallas import tpu as pltpu

# split sizes from the PyTorch module
SPLIT_SIZES = (4, 2, 2, 1)
C_TOTAL = sum(SPLIT_SIZES)  # 9

_LANES_CANDIDATES = (512, 256, 128)   # lane-dense widths (multiples of 128)
_MiB = 1024 * 1024


def _copy_kernel(x_ref, o_ref):
    # split([4,2,2,1]) + cat(...) is the identity permutation, so the whole
    # body is a single full-tile vld/vst.
    o_ref[...] = x_ref[...]


def _block_bytes():
    # ~4 MiB per block everywhere (16 MiB double-buffered in+out: safe on the
    # 64 MiB-VMEM v7x); ~8 MiB on the 128 MiB-VMEM chips (v5e / v6e).
    try:
        vmem = pltpu.get_tpu_info().vmem_capacity_bytes
    except Exception:
        vmem = 0
    return 8 * _MiB if vmem >= 100 * _MiB else 4 * _MiB


def split_cat_model(x, donate_input=False):
    """Identity channel permutation, implemented as one tiled Pallas copy.

    donate_input=True adds input_output_aliases={0: 0}; only use it when the
    caller actually donates x (e.g. jit(..., donate_argnums=0)) — otherwise
    XLA inserts a defensive copy and the aliasing only costs bandwidth.
    """
    N, C, H, W = x.shape
    assert C == C_TOTAL, f"channel dim must be {C_TOTAL}, got {C}"

    total = N * C * H * W
    itemsize = jnp.dtype(x.dtype).itemsize

    # --- pick a 2-D view that divides the tensor exactly (no pad, no slice) ---
    lanes = next((l for l in _LANES_CANDIDATES if total % l == 0), None)
    if lanes is not None:
        rows = total // lanes
    else:
        # Fallback: keep the natural trailing dim as the lane axis; the block
        # spans the full lane extent so the tile is always legal.
        rows, lanes = N * C * H, W
    x2 = x.reshape(rows, lanes)

    # --- block sizing (dtype-aware sublane floor) ---
    min_sub = 8 * max(1, 4 // itemsize)            # f32: 8, bf16: 16, int8: 32
    tgt_rows = max(min_sub, _block_bytes() // max(1, lanes * itemsize))
    tgt_rows = max(min_sub, (tgt_rows // min_sub) * min_sub)
    block_rows = rows if rows <= tgt_rows else tgt_rows   # full extent if small

    grid = (pl.cdiv(rows, block_rows),)            # ragged last block is masked
    block_vmem = block_rows * lanes * itemsize
    vmem_limit = min(64 * _MiB, max(32 * _MiB, 4 * block_vmem + 2 * _MiB))

    out2 = pl.pallas_call(
        _copy_kernel,
        out_shape=jax.ShapeDtypeStruct((rows, lanes), x.dtype),
        grid=grid,
        in_specs=[pl.BlockSpec((block_rows, lanes), lambda i: (i, 0))],
        out_specs=pl.BlockSpec((block_rows, lanes), lambda i: (i, 0)),
        input_output_aliases=({0: 0} if donate_input else {}),
        compiler_params=pltpu.CompilerParams(
            dimension_semantics=("parallel",),
            vmem_limit_bytes=vmem_limit,
        ),
        cost_estimate=pl.CostEstimate(
            flops=0, transcendentals=0, bytes_accessed=2 * total * itemsize),
    )(x2)

    return out2.reshape(N, C, H, W)


if __name__ == "__main__":
    key = jax.random.PRNGKey(0)
    # Channel dim must be 9 so split([4, 2, 2, 1], dim=1) is valid.
    x = jax.random.normal(key, (2, C_TOTAL, 16, 16), dtype=jnp.float32)

    fwd = jax.jit(split_cat_model)
    out = jax.block_until_ready(fwd(x))

    # Reference: the literal split + cat sequence from the PyTorch module.
    t0, t1, t2, t3 = jnp.split(x, [4, 6, 8], axis=1)
    ref = jnp.concatenate(
        (jnp.concatenate((t0, t1), 1), jnp.concatenate((t2, t3), 1)), 1)

    assert out.shape == ref.shape
    assert jnp.allclose(out, ref), "mismatch vs reference"

    print("KERNEL_OK")
</pallas_src>

<mosaic_0001>
module attributes {stable_mosaic.version = 11 : i64} {
  func.func @_copy_kernel(%arg0: i32, %arg1: memref<9x512xf32, #tpu.memory_space<vmem>>, %arg2: memref<9x512xf32, #tpu.memory_space<vmem>>) attributes {dimension_semantics = [#tpu.dimension_semantics<parallel>], iteration_bounds = array<i64: 1>, scalar_prefetch = 0 : i64, scratch_operands = 0 : i64, tpu.core_type = #tpu.core_type<tc>, window_params = [{transform_indices = @transform_0, window_bounds = array<i64: 9, 512>}, {transform_indices = @transform_1, window_bounds = array<i64: 9, 512>}]} {
    %c0 = arith.constant 0 : index
    %c0_0 = arith.constant 0 : index
    %0 = vector.load %arg1[%c0, %c0_0] : memref<9x512xf32, #tpu.memory_space<vmem>>, vector<9x512xf32>
    %c0_1 = arith.constant 0 : index
    %c0_2 = arith.constant 0 : index
    %1 = vector.load %arg2[%c0_1, %c0_2] : memref<9x512xf32, #tpu.memory_space<vmem>>, vector<9x512xf32>
    tpu.vector_store %arg2[%c0_1, %c0_2], %0 {strides = array<i32>} : memref<9x512xf32, #tpu.memory_space<vmem>>, vector<9x512xf32>,
    return
  }
  func.func @transform_0(%arg0: i32) -> (i32, i32) {
    %c0_i32 = arith.constant 0 : i32
    %c0_i32_0 = arith.constant 0 : i32
    return %arg0, %c0_i32 : i32, i32
  }
  func.func @transform_1(%arg0: i32) -> (i32, i32) {
    %c0_i32 = arith.constant 0 : i32
    %c0_i32_0 = arith.constant 0 : i32
    return %arg0, %c0_i32 : i32, i32
  }
}

</mosaic_0001>

<bundles_post_ra>
// kernel: split_cat_model.1
= control target key start
LH: loop header
LB: loop body
LE: loop exit
PB: predicated region body
PF: predicated region fallthrough
CT: control target
= control target key end

     0   :  { %s86_s0 = inlined_call_operand.vmem [shape: f32[9,512], index: 0, kind: input, shape index: {}]   ;;  %s87_s1 = inlined_call_operand.vmem [shape: f32[9,512], index: 1, kind: output, shape index: {}]  }
   0x1   :  { %v8_v0 = vld [vmem:[%s86_s0] sm:$0xff]  ;;  %v9_v1 = vld [vmem:[%s86_s0 + $0x8] sm:$0xff]  ;;  %v10_v2 = vld [vmem:[%s86_s0 + $0x10] sm:$0xff] }
   0x2   :  { %16 = vst [vmem:[%s87_s1] sm:$0xff] %v8_v0  ;;  %17 = vst [vmem:[%s87_s1 + $0x8] sm:$0xff] %v9_v1  ;;  %v11_v3 = vld [vmem:[%s86_s0 + $0x18] sm:$0xff]  ;;  %v12_v4 = vld [vmem:[%s86_s0 + $0x20] sm:$0x1] }
   0x3   :  { %18 = vst [vmem:[%s87_s1 + $0x10] sm:$0xff] %v10_v2  ;;  %v13_v5 = vld [vmem:[%s86_s0 + $0x28] sm:$0x1]  ;;  %19 = vst [vmem:[%s87_s1 + $0x18] sm:$0xff] %v11_v3  ;;  %v14_v6 = vld [vmem:[%s86_s0 + $0x30] sm:$0x1] }
   0x4   :  { %20 = vst [vmem:[%s87_s1 + $0x20] sm:$0x1] %v12_v4  ;;  %21 = vst [vmem:[%s87_s1 + $0x28] sm:$0x1] %v13_v5  ;;  %v15_v7 = vld [vmem:[%s86_s0 + $0x38] sm:$0x1] }
   0x5   :  { %22 = vst [vmem:[%s87_s1 + $0x30] sm:$0x1] %v14_v6  ;;  %23 = vst [vmem:[%s87_s1 + $0x38] sm:$0x1] %v15_v7 }

</bundles_post_ra>
